<compile_context>
chip_gen: v6e
topology: v6e:2x2x1
jax: 0.10.0
libtpu: 0.0.40
codegen_flags: <defaults>
</compile_context>

<pallas_src>
import jax
import jax.numpy as jnp
from jax.experimental import pallas as pl
from jax.experimental.pallas import tpu as pltpu

_MiB = 1024 * 1024


def _norm_kernel(img_ref, sb_ref, out_ref):
    # img_ref / out_ref: (TR, TL) tile.  sb_ref: (TR, 2) f32 per-row constants
    # (col 0 = 1/std, col 1 = -mean/std).  One VPU FMA per element, in f32.
    scale = sb_ref[:, 0:1]
    bias = sb_ref[:, 1:2]
    x = img_ref[...].astype(jnp.float32)
    out_ref[...] = (x * scale + bias).astype(out_ref.dtype)


def _vmem_capacity_bytes() -> int:
    try:
        cap = getattr(pltpu.get_tpu_info(), "vmem_capacity_bytes", None)
        if cap:
            return int(cap)
    except Exception:
        pass
    return 64 * _MiB  # conservative default (v7x-class VMEM)


def _choose_block(N, L, itemsize, target_bytes):
    """Budget-driven (TR, TL) tile; ragged edges are handled by a cdiv grid."""
    lane = 128
    # dtype-aware sublane packing: 8 rows f32, 16 bf16, 32 int8/fp8.
    sublane = 8 * max(1, 4 // max(1, itemsize))
    row_bytes = L * itemsize
    min_tr = N if N < sublane else sublane

    if min_tr * row_bytes <= target_bytes:
        # Full-width rows fit the budget: keep tl = L (fully contiguous HBM DMA
        # per block) and grow tr toward the byte target.
        tl = L
        if N < sublane:
            tr = N
        else:
            budget_rows = max(sublane, target_bytes // row_bytes)
            tr = max(sublane,
                     min((budget_rows // sublane) * sublane,
                         (N // sublane) * sublane))
    else:
        # Even a minimal-height full-width block busts the budget: split
        # columns into 128-lane multiples sized near the byte target.
        tr = min_tr
        tl = max(lane, (target_bytes // (tr * itemsize) // lane) * lane)
        tl = min(tl, max(lane, (L // lane) * lane))

    # Grow the grid to >=8 steps (>=4 per v7x TensorCore, and enough for the
    # double-buffered pipeline to hide DMAs) when the tensor is big enough,
    # without shrinking tiles below a useful DMA granule.
    min_tile_bytes = 512 * 1024
    while (pl.cdiv(N, tr) * pl.cdiv(L, tl) < 8
           and tr * tl * itemsize > 2 * min_tile_bytes):
        if tr >= 2 * sublane:
            tr = max(sublane, ((tr // 2) // sublane) * sublane)
        elif tl == L and L > 2 * lane:
            tl = ((L // 2 + lane - 1) // lane) * lane
        elif tl % lane == 0 and tl >= 2 * lane:
            tl = max(lane, ((tl // 2) // lane) * lane)
        else:
            break
    return tr, tl


def normalization(img: jax.Array, mean: jax.Array, std: jax.Array) -> jax.Array:
    """(img - mean.view(-1,1,1)) / std.view(-1,1,1), img in NCHW."""
    B, C, H, W = img.shape
    assert mean.shape == (C,) and std.shape == (C,)
    N, L = B * C, H * W
    itemsize = jnp.dtype(img.dtype).itemsize

    # Fold mean/std into one FMA; computed and kept in f32 for precision.
    scale = 1.0 / std.astype(jnp.float32)                      # (C,)
    bias = -mean.astype(jnp.float32) * scale                   # (C,)
    sb = jnp.stack([jnp.tile(scale, B), jnp.tile(bias, B)], axis=1)  # (N, 2) f32

    # Free reshape of the contiguous NCHW tensor into a lane-dense 2-D slab.
    x = img.reshape(N, L)

    vmem_cap = _vmem_capacity_bytes()
    target = 4 * _MiB if vmem_cap <= 96 * _MiB else 8 * _MiB   # v7x vs v5e/v6e
    tr, tl = _choose_block(N, L, itemsize, target)
    grid = (pl.cdiv(N, tr), pl.cdiv(L, tl))

    tile_bytes = tr * tl * itemsize
    # Double-buffered in + out tiles plus constants/headroom, clamped well below
    # physical VMEM (~51 MiB on v7x, <=100 MiB on v5e/v6e) and at least 32 MiB
    # so v5e's 16 MiB default scoped VMEM never bites.
    hard_cap = max(32 * _MiB, min(int(vmem_cap * 0.8), 100 * _MiB))
    vmem_limit = max(32 * _MiB, min(4 * tile_bytes + 2 * _MiB, hard_cap))

    out = pl.pallas_call(
        _norm_kernel,
        out_shape=jax.ShapeDtypeStruct((N, L), img.dtype),
        grid=grid,
        in_specs=[
            pl.BlockSpec((tr, tl), lambda i, j: (i, j)),
            pl.BlockSpec((tr, 2), lambda i, j: (i, 0)),
        ],
        out_specs=pl.BlockSpec((tr, tl), lambda i, j: (i, j)),
        compiler_params=pltpu.CompilerParams(
            dimension_semantics=("parallel", "parallel"),
            vmem_limit_bytes=int(vmem_limit),
        ),
    )(x, sb)

    # TODO(synk): fuse this normalization into the downstream conv/matmul
    # consumer's load path — standalone it costs a full extra HBM round-trip.
    return out.reshape(B, C, H, W)


if __name__ == "__main__":
    # Deterministic parameters (ImageNet mean/std as in the PyTorch module).
    mean = jnp.array([0.485, 0.456, 0.406], dtype=jnp.float32)
    std = jnp.array([0.229, 0.224, 0.225], dtype=jnp.float32)

    # Small deterministic input: batch=2, channels=3 (match mean/std), 16x16.
    key = jax.random.PRNGKey(0)
    img = jax.random.uniform(key, (2, 3, 16, 16), dtype=jnp.float32)

    out = jax.block_until_ready(normalization(img, mean, std))

    # Reference (plain JAX broadcasting, mirrors PyTorch semantics).
    ref = (img - mean.reshape(-1, 1, 1)) / std.reshape(-1, 1, 1)
    assert out.shape == img.shape and out.dtype == img.dtype
    # scale/bias FMA vs true divide differs by ~1 ulp; allow tiny absolute slack.
    assert jnp.allclose(out, ref, atol=1e-5, rtol=1e-6)

    print("KERNEL_OK")
</pallas_src>

<mosaic_0001>
module attributes {stable_mosaic.version = 11 : i64} {
  func.func @_norm_kernel(%arg0: i32, %arg1: i32, %arg2: memref<6x256xf32, #tpu.memory_space<vmem>>, %arg3: memref<6x2xf32, #tpu.memory_space<vmem>>, %arg4: memref<6x256xf32, #tpu.memory_space<vmem>>) attributes {dimension_semantics = [#tpu.dimension_semantics<parallel>, #tpu.dimension_semantics<parallel>], iteration_bounds = array<i64: 1, 1>, scalar_prefetch = 0 : i64, scratch_operands = 0 : i64, tpu.core_type = #tpu.core_type<tc>, window_params = [{transform_indices = @transform_0, window_bounds = array<i64: 6, 256>}, {transform_indices = @transform_1, window_bounds = array<i64: 6, 2>}, {transform_indices = @transform_2, window_bounds = array<i64: 6, 256>}]} {
    %c0 = arith.constant 0 : index
    %c0_0 = arith.constant 0 : index
    %0 = vector.load %arg3[%c0, %c0_0] : memref<6x2xf32, #tpu.memory_space<vmem>>, vector<6x1xf32>
    %c0_1 = arith.constant 0 : index
    %c1 = arith.constant 1 : index
    %1 = vector.load %arg3[%c0_1, %c1] : memref<6x2xf32, #tpu.memory_space<vmem>>, vector<6x1xf32>
    %c0_2 = arith.constant 0 : index
    %c0_3 = arith.constant 0 : index
    %2 = vector.load %arg2[%c0_2, %c0_3] : memref<6x256xf32, #tpu.memory_space<vmem>>, vector<6x256xf32>
    %3 = vector.broadcast %0 : vector<6x1xf32> to vector<6x256xf32>
    %4 = arith.mulf %2, %3 : vector<6x256xf32>
    %5 = vector.broadcast %1 : vector<6x1xf32> to vector<6x256xf32>
    %6 = arith.addf %4, %5 : vector<6x256xf32>
    %c0_4 = arith.constant 0 : index
    %c0_5 = arith.constant 0 : index
    %7 = vector.load %arg4[%c0_4, %c0_5] : memref<6x256xf32, #tpu.memory_space<vmem>>, vector<6x256xf32>
    tpu.vector_store %arg4[%c0_4, %c0_5], %6 {strides = array<i32>} : memref<6x256xf32, #tpu.memory_space<vmem>>, vector<6x256xf32>,
    return
  }
  func.func @transform_0(%arg0: i32, %arg1: i32) -> (i32, i32) {
    %c0_i32 = arith.constant 0 : i32
    return %arg0, %arg1 : i32, i32
  }
  func.func @transform_1(%arg0: i32, %arg1: i32) -> (i32, i32) {
    %c0_i32 = arith.constant 0 : i32
    %c0_i32_0 = arith.constant 0 : i32
    return %arg0, %c0_i32 : i32, i32
  }
  func.func @transform_2(%arg0: i32, %arg1: i32) -> (i32, i32) {
    %c0_i32 = arith.constant 0 : i32
    return %arg0, %arg1 : i32, i32
  }
}

</mosaic_0001>

<bundles_post_ra>
// kernel: tpu_custom_call.1
= control target key start
LH: loop header
LB: loop body
LE: loop exit
PB: predicated region body
PF: predicated region fallthrough
CT: control target
= control target key end

     0   :  { %7 = vsyncpa [#allocation3], 0  ;;  %s135_s0 = inlined_call_operand.hbm [shape: f32[6,256], index: 0, kind: input, shape index: {}]   ;;  %s136_s1 = inlined_call_operand.vmem [shape: f32[6,2], index: 1, kind: input, shape index: {}]   ;;  %s137_s2 = inlined_call_operand.hbm [shape: f32[6,256], index: 2, kind: output, shape index: {}]  }
   0x1   :  { %8 = vsyncpa [#allocation4], 0  ;;  %s107_s9 = smov [#allocation2]  }
   0x2   :  { %s15_s10 = sshll.u32 %s107_s9, 4  ;;  %s16_s10 = int_to_ptr.vmem [resolvable:$true] %s15_s10 }
   0x3   :  { %s71_s11 = scalar_lea.vmem %s16_s10, 256  ;;  %p76_p1 = scmp.lt.s32.totalorder %s16_s10, %s16_s10 }
   0x4   :  { %p72_p0 = scmp.ne.s32.totalorder %s16_s10, %s71_s11  ;;  %p77_p2 = scmp.lt.s32.totalorder %s71_s11, %s71_s11 }
   0x6   :  { %p78_p3 = por %p77_p2, %p76_p1 }
   0x8   :  { %p79_p4 = pnand %p78_p3, %p72_p0 }
   0xa   :  { %82 = shalt.err (!%p79_p4)
}
   0xb   :  { %18 = dma.hbm_to_vmem [thread:$0]  %s135_s0, 256, %s16_s10, [#allocation3]  }
   0xc   :  { %103 = dma.done.wait [#allocation3], 256  }
   0xd   :  { %104 = vsyncadd [#allocation3], 4294967040  ;;  %v108_v0 = vmov 0   ;;  %v24_v1 = vld [vmem:[%s136_s1] sm:$0x3f]  ;;  %v109_v2 = vmov 1  }
   0xe   :  { %61 = vset.pattern.permute.xlu0 %v108_v0  ;;  %v25_v4 = vld [vmem:[#allocation2] sm:$0x3f]  ;;  %v26_v5 = vld [vmem:[#allocation2 + $0x8] sm:$0x3f]  ;;  %s110_s16 = smov [#allocation5]  }
   0xf   :  { %29 = vperm.xlu0 %61, %v24_v1   ;;  %s48_s17 = sshll.u32 %s110_s16, 4  ;;  %s49_s17 = int_to_ptr.vmem [resolvable:$true] %s48_s17 }
  0x10   :  { %s83_s0 = scalar_lea.vmem %s49_s17, 256  ;;  %p88_p6 = scmp.lt.s32.totalorder %s49_s17, %s49_s17 }
  0x11   :  { %p84_p5 = scmp.ne.s32.totalorder %s49_s17, %s83_s0  ;;  %p89_p7 = scmp.lt.s32.totalorder %s83_s0, %s83_s0 }
  0x13   :  { %62 = vset.pattern.permute.xlu0 %v109_v2  ;;  %p90_p8 = por %p89_p7, %p88_p6 }
  0x14   :  { %35 = vperm.xlu0 %62, %v24_v1  }
  0x15   :  { %p91_p9 = pnand %p90_p8, %p84_p5 }
  0x8a   :  { %v30_v3 = vpop.permute.xlu0 %29 }
  0x8b   :  { %v32_v6 = vmul.f32 %v30_v3, %v25_v4  ;;  %v33_v7 = vmul.f32 %v30_v3, %v26_v5 }
  0x8f   :  { %v36_v8 = vpop.permute.xlu0 %35 }
  0x90   :  { %v38_v9 = vadd.f32 %v36_v8, %v32_v6  ;;  %v39_v10 = vadd.f32 %v36_v8, %v33_v7 }
  0x92   :  { %40 = vst [vmem:[#allocation5] sm:$0x3f] %v38_v9  ;;  %41 = vst [vmem:[#allocation5 + $0x8] sm:$0x3f] %v39_v10 }
  0x93   :  { %94 = shalt.err (!%p91_p9)
}
  0x94   :  { %51 = dma.vmem_to_hbm [thread:$0]  %s49_s17, 256, %s137_s2, [#allocation4]  }
  0x95   :  { %105 = dma.done.wait [#allocation4], 256  }
  0x96   :  { %106 = vsyncadd [#allocation4], 4294967040 }
  0x97   :  { %55 = vsyncpa [#allocation3], 1 }
  0x98   :  { %56 = vsyncpa [#allocation4], 1 }

</bundles_post_ra>
